<compile_context>
chip_gen: v7x
topology: tpu7x:2x2x1
jax: 0.10.0
libtpu: 0.0.40
codegen_flags: <defaults>
</compile_context>

<pallas_src>
import functools

import jax
import jax.numpy as jnp
from jax.experimental import pallas as pl
from jax.experimental.pallas import tpu as pltpu

LN_EPS = 1e-5               # PyTorch nn.LayerNorm default
_LANES = 128
_MAX_PACK = 16
_TILE_ROWS_TARGET = 512     # packed rows per grid step (~1.5 MiB double-buffered)


def _choose_pack(input_dim, embed_dim):
    """Smallest power-of-two row packing that makes both GEMM operands lane-dense."""
    pack = 1
    while pack < _MAX_PACK and (input_dim * pack < _LANES or embed_dim * pack < _LANES):
        pack *= 2
    return pack


def prepare_params(weight, bias, gamma, beta):
    """One-time parameter staging (hoists transpose / block-diag out of the call path).

    weight: [embed_dim, input_dim]  (PyTorch nn.Linear layout)
    bias, gamma, beta: [embed_dim]
    """
    embed_dim, input_dim = weight.shape
    pack = _choose_pack(input_dim, embed_dim)

    w_t = weight.T                                         # (in, emb)
    if pack > 1:
        eye = jnp.eye(pack, dtype=w_t.dtype)
        # Block-diagonal weight: (pack*in, pack*emb), block q holds w_t.
        w_k = (eye[:, None, :, None] * w_t[None, :, None, :]).reshape(
            pack * input_dim, pack * embed_dim)
        # Block-diagonal averaging matrix for per-row LayerNorm statistics.
        r = jax.lax.broadcasted_iota(jnp.int32, (pack * embed_dim,) * 2, 0) // embed_dim
        c = jax.lax.broadcasted_iota(jnp.int32, (pack * embed_dim,) * 2, 1) // embed_dim
        m_avg = jnp.where(r == c, 1.0 / embed_dim, 0.0).astype(jnp.float32)
    else:
        w_k = w_t
        m_avg = None

    def _tile(v):
        return jnp.tile(v.reshape(1, embed_dim), (1, pack))  # (1, pack*emb)

    return dict(w=w_k, b=_tile(bias), g=_tile(gamma), beta=_tile(beta), m=m_avg,
                pack=pack, input_dim=input_dim, embed_dim=embed_dim)


def _fused_linear_ln_kernel(x_ref, w_ref, b_ref, g_ref, bt_ref, *rest,
                            embed_dim, pack):
    if pack > 1:
        m_ref, o_ref = rest
    else:
        (o_ref,) = rest

    # Linear: x @ W + b.  Operands stay in their native dtype; f32 accumulate.
    emb = jnp.dot(x_ref[...], w_ref[...], preferred_element_type=jnp.float32)
    emb = emb + b_ref[...].astype(jnp.float32)

    # Per-row LayerNorm.  In the packed layout each VMEM row holds `pack`
    # independent rows side by side; the block-diagonal averaging matmul
    # yields each segment's mean/var (divided by the true embed_dim).
    if pack > 1:
        mean = jnp.dot(emb, m_ref[...], preferred_element_type=jnp.float32)
        centered = emb - mean
        var = jnp.dot(centered * centered, m_ref[...],
                      preferred_element_type=jnp.float32)
    else:
        mean = jnp.mean(emb, axis=-1, keepdims=True)
        centered = emb - mean
        var = jnp.mean(centered * centered, axis=-1, keepdims=True)

    inv = jax.lax.rsqrt(var + LN_EPS)
    out = centered * inv * g_ref[...].astype(jnp.float32) \
        + bt_ref[...].astype(jnp.float32)
    o_ref[...] = out.astype(o_ref.dtype)


def float_feature_embedding(x, params):
    """Fused Linear + LayerNorm.  x: [B, input_dim] -> [B, embed_dim]."""
    pack = params["pack"]
    input_dim = params["input_dim"]
    embed_dim = params["embed_dim"]
    B = x.shape[0]
    assert x.shape[1] == input_dim

    lane_in = pack * input_dim
    lane_out = pack * embed_dim

    # Packed ("super-row") view of the batch.
    P = pl.cdiv(B, pack)
    if P <= _TILE_ROWS_TARGET:
        tile_p = P                                   # single full-extent tile
        p_pad = P
    else:
        tile_p = _TILE_ROWS_TARGET                   # multiple of 8
        p_pad = pl.cdiv(P, tile_p) * tile_p
    b_pad = p_pad * pack
    if b_pad != B:
        x = jnp.pad(x, ((0, b_pad - B), (0, 0)))     # zero rows, sliced off below
    x_p = x.reshape(p_pad, lane_in)                  # free row-major bitcast

    grid = (p_pad // tile_p,)
    row_spec = lambda i: (i, 0)
    const_spec = lambda i: (0, 0)                    # resident across grid steps

    in_arrays = [x_p, params["w"], params["b"], params["g"], params["beta"]]
    in_specs = [
        pl.BlockSpec((tile_p, lane_in), row_spec),
        pl.BlockSpec((lane_in, lane_out), const_spec),
        pl.BlockSpec((1, lane_out), const_spec),
        pl.BlockSpec((1, lane_out), const_spec),
        pl.BlockSpec((1, lane_out), const_spec),
    ]
    if pack > 1:
        in_arrays.append(params["m"])
        in_specs.append(pl.BlockSpec((lane_out, lane_out), const_spec))

    kernel = functools.partial(_fused_linear_ln_kernel,
                               embed_dim=embed_dim, pack=pack)

    out_p = pl.pallas_call(
        kernel,
        out_shape=jax.ShapeDtypeStruct((p_pad, lane_out), x.dtype),
        grid=grid,
        in_specs=in_specs,
        out_specs=pl.BlockSpec((tile_p, lane_out), row_spec),
        compiler_params=pltpu.CompilerParams(
            dimension_semantics=("parallel",),
        ),
    )(*in_arrays)

    # (p_pad, pack*emb) and (b_pad, emb) share the same row-major layout, so
    # this reshape is a free bitcast; slice off batch padding.
    return out_p.reshape(b_pad, embed_dim)[:B]


def _reference(x, weight, bias, gamma, beta):
    emb = x @ weight.T + bias
    mean = jnp.mean(emb, axis=-1, keepdims=True)
    var = jnp.mean((emb - mean) ** 2, axis=-1, keepdims=True)
    return (emb - mean) / jnp.sqrt(var + LN_EPS) * gamma + beta


if __name__ == "__main__":
    # Shapes consistent with the module: input_dim=16, embed_dim=32.
    input_dim, embed_dim = 16, 32

    key = jax.random.PRNGKey(0)
    kx, kx2, kw, kb = jax.random.split(key, 4)

    bound = 1.0 / (input_dim ** 0.5)
    weight = jax.random.uniform(kw, (embed_dim, input_dim),
                                minval=-bound, maxval=bound, dtype=jnp.float32)
    bias = jax.random.uniform(kb, (embed_dim,),
                              minval=-bound, maxval=bound, dtype=jnp.float32)
    gamma = jnp.ones((embed_dim,), dtype=jnp.float32)   # LayerNorm default
    beta = jnp.zeros((embed_dim,), dtype=jnp.float32)   # LayerNorm default

    params = prepare_params(weight, bias, gamma, beta)  # one-time staging

    # Case 1: batch divisible by the row-packing factor.
    B1 = 64
    x1 = jax.random.normal(kx, (B1, input_dim), dtype=jnp.float32)
    out1 = jax.block_until_ready(float_feature_embedding(x1, params))
    ref1 = _reference(x1, weight, bias, gamma, beta)
    assert out1.shape == (B1, embed_dim)
    assert jnp.allclose(out1, ref1, atol=1e-4, rtol=1e-4), "mismatch vs reference (B=64)"

    # Case 2: ragged batch (exercises the padding / slice-off path).
    B2 = 37
    x2 = jax.random.normal(kx2, (B2, input_dim), dtype=jnp.float32)
    out2 = jax.block_until_ready(float_feature_embedding(x2, params))
    ref2 = _reference(x2, weight, bias, gamma, beta)
    assert out2.shape == (B2, embed_dim)
    assert jnp.allclose(out2, ref2, atol=1e-4, rtol=1e-4), "mismatch vs reference (B=37)"

    print("KERNEL_OK")
</pallas_src>

<mosaic_0001>
module attributes {stable_mosaic.version = 11 : i64} {
  func.func @_fused_linear_ln_kernel(%arg0: i32, %arg1: memref<8x128xf32, #tpu.memory_space<vmem>>, %arg2: memref<128x256xf32, #tpu.memory_space<vmem>>, %arg3: memref<1x256xf32, #tpu.memory_space<vmem>>, %arg4: memref<1x256xf32, #tpu.memory_space<vmem>>, %arg5: memref<1x256xf32, #tpu.memory_space<vmem>>, %arg6: memref<256x256xf32, #tpu.memory_space<vmem>>, %arg7: memref<8x256xf32, #tpu.memory_space<vmem>>) attributes {dimension_semantics = [#tpu.dimension_semantics<parallel>], iteration_bounds = array<i64: 1>, scalar_prefetch = 0 : i64, scratch_operands = 0 : i64, tpu.core_type = #tpu.core_type<tc>, window_params = [{transform_indices = @transform_0, window_bounds = array<i64: 8, 128>}, {pipeline_mode = #tpu.pipeline_mode<synchronous>, transform_indices = @transform_1, window_bounds = array<i64: 128, 256>}, {pipeline_mode = #tpu.pipeline_mode<synchronous>, transform_indices = @transform_2, window_bounds = array<i64: 1, 256>}, {pipeline_mode = #tpu.pipeline_mode<synchronous>, transform_indices = @transform_3, window_bounds = array<i64: 1, 256>}, {pipeline_mode = #tpu.pipeline_mode<synchronous>, transform_indices = @transform_4, window_bounds = array<i64: 1, 256>}, {pipeline_mode = #tpu.pipeline_mode<synchronous>, transform_indices = @transform_5, window_bounds = array<i64: 256, 256>}, {transform_indices = @transform_6, window_bounds = array<i64: 8, 256>}]} {
    %c0 = arith.constant 0 : index
    %c0_0 = arith.constant 0 : index
    %0 = vector.load %arg1[%c0, %c0_0] : memref<8x128xf32, #tpu.memory_space<vmem>>, vector<8x128xf32>
    %c0_1 = arith.constant 0 : index
    %c0_2 = arith.constant 0 : index
    %1 = vector.load %arg2[%c0_1, %c0_2] : memref<128x256xf32, #tpu.memory_space<vmem>>, vector<128x256xf32>
    %cst = arith.constant dense<0.000000e+00> : vector<8x256xf32>
    %2 = tpu.matmul %0, %1, %cst {dimension_numbers = #tpu.dot_dimension_numbers<[1], [0], [0], [1], [0, 0, 1, 1], [], []>} : vector<8x128xf32>, vector<128x256xf32>, vector<8x256xf32> -> vector<8x256xf32>
    %c0_3 = arith.constant 0 : index
    %c0_4 = arith.constant 0 : index
    %3 = vector.load %arg3[%c0_3, %c0_4] : memref<1x256xf32, #tpu.memory_space<vmem>>, vector<1x256xf32>
    %4 = vector.broadcast %3 : vector<1x256xf32> to vector<8x256xf32>
    %5 = arith.addf %2, %4 : vector<8x256xf32>
    %c0_5 = arith.constant 0 : index
    %c0_6 = arith.constant 0 : index
    %6 = vector.load %arg6[%c0_5, %c0_6] : memref<256x256xf32, #tpu.memory_space<vmem>>, vector<256x256xf32>
    %cst_7 = arith.constant dense<0.000000e+00> : vector<8x256xf32>
    %7 = tpu.matmul %5, %6, %cst_7 {dimension_numbers = #tpu.dot_dimension_numbers<[1], [0], [0], [1], [0, 0, 1, 1], [], []>} : vector<8x256xf32>, vector<256x256xf32>, vector<8x256xf32> -> vector<8x256xf32>
    %8 = arith.subf %5, %7 : vector<8x256xf32>
    %9 = arith.mulf %8, %8 : vector<8x256xf32>
    %c0_8 = arith.constant 0 : index
    %c0_9 = arith.constant 0 : index
    %10 = vector.load %arg6[%c0_8, %c0_9] : memref<256x256xf32, #tpu.memory_space<vmem>>, vector<256x256xf32>
    %cst_10 = arith.constant dense<0.000000e+00> : vector<8x256xf32>
    %11 = tpu.matmul %9, %10, %cst_10 {dimension_numbers = #tpu.dot_dimension_numbers<[1], [0], [0], [1], [0, 0, 1, 1], [], []>} : vector<8x256xf32>, vector<256x256xf32>, vector<8x256xf32> -> vector<8x256xf32>
    %cst_11 = arith.constant 9.99999974E-6 : f32
    %12 = vector.broadcast %cst_11 : f32 to vector<8x256xf32>
    %13 = arith.addf %11, %12 : vector<8x256xf32>
    %14 = math.rsqrt %13 : vector<8x256xf32>
    %15 = arith.mulf %8, %14 : vector<8x256xf32>
    %c0_12 = arith.constant 0 : index
    %c0_13 = arith.constant 0 : index
    %16 = vector.load %arg4[%c0_12, %c0_13] : memref<1x256xf32, #tpu.memory_space<vmem>>, vector<1x256xf32>
    %17 = vector.broadcast %16 : vector<1x256xf32> to vector<8x256xf32>
    %18 = arith.mulf %15, %17 : vector<8x256xf32>
    %c0_14 = arith.constant 0 : index
    %c0_15 = arith.constant 0 : index
    %19 = vector.load %arg5[%c0_14, %c0_15] : memref<1x256xf32, #tpu.memory_space<vmem>>, vector<1x256xf32>
    %20 = vector.broadcast %19 : vector<1x256xf32> to vector<8x256xf32>
    %21 = arith.addf %18, %20 : vector<8x256xf32>
    %c0_16 = arith.constant 0 : index
    %c0_17 = arith.constant 0 : index
    %22 = vector.load %arg7[%c0_16, %c0_17] : memref<8x256xf32, #tpu.memory_space<vmem>>, vector<8x256xf32>
    tpu.vector_store %arg7[%c0_16, %c0_17], %21 {strides = array<i32>} : memref<8x256xf32, #tpu.memory_space<vmem>>, vector<8x256xf32>,
    return
  }
  func.func @transform_0(%arg0: i32) -> (i32, i32) {
    %c0_i32 = arith.constant 0 : i32
    %c0_i32_0 = arith.constant 0 : i32
    return %arg0, %c0_i32 : i32, i32
  }
  func.func @transform_1(%arg0: i32) -> (i32, i32) {
    %c0_i32 = arith.constant 0 : i32
    %c0_i32_0 = arith.constant 0 : i32
    %c0_i32_1 = arith.constant 0 : i32
    return %c0_i32, %c0_i32_0 : i32, i32
  }
  func.func @transform_2(%arg0: i32) -> (i32, i32) {
    %c0_i32 = arith.constant 0 : i32
    %c0_i32_0 = arith.constant 0 : i32
    %c0_i32_1 = arith.constant 0 : i32
    return %c0_i32, %c0_i32_0 : i32, i32
  }
  func.func @transform_3(%arg0: i32) -> (i32, i32) {
    %c0_i32 = arith.constant 0 : i32
    %c0_i32_0 = arith.constant 0 : i32
    %c0_i32_1 = arith.constant 0 : i32
    return %c0_i32, %c0_i32_0 : i32, i32
  }
  func.func @transform_4(%arg0: i32) -> (i32, i32) {
    %c0_i32 = arith.constant 0 : i32
    %c0_i32_0 = arith.constant 0 : i32
    %c0_i32_1 = arith.constant 0 : i32
    return %c0_i32, %c0_i32_0 : i32, i32
  }
  func.func @transform_5(%arg0: i32) -> (i32, i32) {
    %c0_i32 = arith.constant 0 : i32
    %c0_i32_0 = arith.constant 0 : i32
    %c0_i32_1 = arith.constant 0 : i32
    return %c0_i32, %c0_i32_0 : i32, i32
  }
  func.func @transform_6(%arg0: i32) -> (i32, i32) {
    %c0_i32 = arith.constant 0 : i32
    %c0_i32_0 = arith.constant 0 : i32
    return %arg0, %c0_i32 : i32, i32
  }
}

</mosaic_0001>

<bundles_post_ra>
// kernel: tpu_custom_call.1
= control target key start
LH: loop header
LB: loop body
LE: loop exit
PB: predicated region body
PF: predicated region fallthrough
CT: control target
= control target key end

     0   :  { %11 = vsyncpa [#allocation3], 0  ;;  %s877_s0 = inlined_call_operand.hbm [shape: f32[8,128], index: 0, kind: input, shape index: {}]   ;;  %s878_s1 = inlined_call_operand.hbm [shape: f32[128,256], index: 1, kind: input, shape index: {}]   ;;  %s879_s2 = inlined_call_operand.vmem [shape: f32[1,256], index: 2, kind: input, shape index: {}]   ;;  %s880_s3 = inlined_call_operand.vmem [shape: f32[1,256], index: 3, kind: input, shape index: {}]   ;;  %s881_s4 = inlined_call_operand.vmem [shape: f32[1,256], index: 4, kind: input, shape index: {}]   ;;  %s882_s5 = inlined_call_operand.hbm [shape: f32[256,256], index: 5, kind: input, shape index: {}]   ;;  %s883_s6 = inlined_call_operand.hbm [shape: f32[8,256], index: 6, kind: output, shape index: {}]  }
   0x1   :  { %12 = vsyncpa [#allocation6], 0 }
   0x2   :  { %13 = vsyncpa [#allocation4], 0  ;;  %s704_s21 = smov [#allocation5]   ;;  %s610_s25 = scalar_lea.hbm %s878_s1, 4096 }
   0x3   :  { %s29_s22 = sshll.u32 %s704_s21, 4  ;;  %p611_p0 = scmp.ne.s32.totalorder %s878_s1, %s610_s25  ;;  %s30_s22 = int_to_ptr.vmem [resolvable:$true] %s29_s22 }
   0x4   :  { %p614_p1 = scmp.lt.u32.totalorder %s610_s25, %s878_s1 }
   0x6   :  { %p616_p2 = pnand %p614_p1, %p611_p0 }
   0x8   :  { %619 = shalt.err (!%p616_p2)
}
   0x9   :  { %s620_s30 = scalar_lea.vmem %s30_s22, 4096  ;;  %p625_p4 = scmp.lt.s32.totalorder %s30_s22, %s30_s22 }
   0xa   :  { %p621_p3 = scmp.ne.s32.totalorder %s30_s22, %s620_s30  ;;  %p626_p5 = scmp.lt.s32.totalorder %s620_s30, %s620_s30 }
   0xc   :  { %p627_p6 = por %p626_p5, %p625_p4 }
   0xe   :  { %p628_p7 = pnand %p627_p6, %p621_p3 }
  0x10   :  { %631 = shalt.err (!%p628_p7)
}
  0x11   :  { %s705_s7 = smov 256   ;;  %s706_s8 = smov 16  }
  0x12   :  { %35 = dma.hbm_to_vmem [thread:$0]  %s878_s1, 4096, %s30_s22, [#allocation6], %s705_s7, %s705_s7, %s706_s8  }
  0x13   :  { %s707_s11 = smov [#allocation2]   ;;  %s708_s13 = smov [#allocation7]  }
  0x14   :  { %s20_s12 = sshll.u32 %s707_s11, 4  ;;  %s47_s14 = sshll.u32 %s708_s13, 4  ;;  %s21_s12 = int_to_ptr.vmem [resolvable:$true] %s20_s12  ;;  %s48_s14 = int_to_ptr.vmem [resolvable:$true] %s47_s14 }
  0x15   :  { %s632_s17 = scalar_lea.hbm %s877_s0, 128 }
  0x16   :  { %p633_p8 = scmp.ne.s32.totalorder %s877_s0, %s632_s17  ;;  %p636_p9 = scmp.lt.u32.totalorder %s632_s17, %s877_s0 }
  0x18   :  { %p638_p10 = pnand %p636_p9, %p633_p8 }
  0x1a   :  { %641 = shalt.err (!%p638_p10)
}
  0x1b   :  { %s642_s1 = scalar_lea.vmem %s21_s12, 128  ;;  %p647_p12 = scmp.lt.s32.totalorder %s21_s12, %s21_s12 }
  0x1c   :  { %p643_p11 = scmp.ne.s32.totalorder %s21_s12, %s642_s1  ;;  %p648_p13 = scmp.lt.s32.totalorder %s642_s1, %s642_s1 }
  0x1e   :  { %p649_p0 = por %p648_p13, %p647_p12 }
  0x20   :  { %p650_p1 = pnand %p649_p0, %p643_p11 }
  0x22   :  { %653 = shalt.err (!%p650_p1)
}
  0x23   :  { %23 = dma.hbm_to_vmem [thread:$0]  %s877_s0, 128, %s21_s12, [#allocation3]  }
  0x24   :  { %s654_s26 = scalar_lea.hbm %s882_s5, 8192 }
  0x25   :  { %p655_p2 = scmp.ne.s32.totalorder %s882_s5, %s654_s26  ;;  %p658_p3 = scmp.lt.u32.totalorder %s654_s26, %s882_s5 }
  0x27   :  { %p660_p4 = pnand %p658_p3, %p655_p2 }
  0x29   :  { %663 = shalt.err (!%p660_p4)
}
  0x2a   :  { %s664_s9 = scalar_lea.vmem %s48_s14, 8192  ;;  %p669_p6 = scmp.lt.s32.totalorder %s48_s14, %s48_s14 }
  0x2b   :  { %p665_p5 = scmp.ne.s32.totalorder %s48_s14, %s664_s9  ;;  %p670_p7 = scmp.lt.s32.totalorder %s664_s9, %s664_s9 }
  0x2d   :  { %p671_p8 = por %p670_p7, %p669_p6 }
  0x2f   :  { %p672_p9 = pnand %p671_p8, %p665_p5 }
  0x31   :  { %675 = shalt.err (!%p672_p9)
}
  0x32   :  { %53 = dma.hbm_to_vmem [thread:$0]  %s882_s5, 8192, %s48_s14, [#allocation6], %s705_s7, %s705_s7, %s706_s8  }
  0x33   :  { %698 = dma.done.wait [#allocation3], 128  }
  0x34   :  { %699 = vsyncadd [#allocation3], 4294967168 }
  0x35   :  { %700 = dma.done.wait [#allocation6], 12288  }
  0x36   :  { %701 = vsyncadd [#allocation6], 4294955008  ;;  %v709_v0 = vmov 0.0   ;;  %v65_v1 = vld [vmem:[#allocation5 + $0x8] sm:$0xff]  ;;  %v67_v2 = vld [vmem:[#allocation5 + $0x18] sm:$0xff]  ;;  %s710_s13 = smov [#allocation8]  }
  0x37   :  { %172 = vmatprep.mubr.f32.mxu0 %v709_v0  ;;  %v64_v3 = vld [vmem:[#allocation5] sm:$0xff]  ;;  %v439_v4 = vpack.c.bf16 %v67_v2, %v65_v1  ;;  %v66_v5 = vld [vmem:[#allocation5 + $0x10] sm:$0xff]  ;;  %v69_v6 = vld [vmem:[#allocation5 + $0x28] sm:$0xff]  ;;  %s429_s14 = sshll.u32 %s710_s13, 4  ;;  %s430_s14 = int_to_ptr.vmem [resolvable:$true] %s429_s14 }
  0x38   :  { %v71_v7 = vld [vmem:[#allocation5 + $0x38] sm:$0xff]  ;;  %v441_v8 = vpack.c.bf16 %v66_v5, %v64_v3  ;;  %v68_v10 = vld [vmem:[#allocation5 + $0x20] sm:$0xff]  ;;  %v70_v11 = vld [vmem:[#allocation5 + $0x30] sm:$0xff]  ;;  %p681_p11 = scmp.lt.s32.totalorder %s430_s14, %s430_s14 }
  0x39   :  { %v443_v9 = vpack.c.bf16 %v71_v7, %v69_v6  ;;  %v73_v12 = vld [vmem:[#allocation5 + $0x48] sm:$0xff]  ;;  %440 = vmatprep.subr.bf16.mxu0 %v439_v4  ;;  %v75_v13 = vld [vmem:[#allocation5 + $0x58] sm:$0xff]  ;;  %v445_v14 = vpack.c.bf16 %v70_v11, %v68_v10  ;;  %v72_v16 = vld [vmem:[#allocation5 + $0x40] sm:$0xff] }
  0x3a   :  { %442 = vmatpush1.bf16.msra.mxu0 %v441_v8  ;;  %v447_v15 = vpack.c.bf16 %v75_v13, %v73_v12  ;;  %v74_v17 = vld [vmem:[#allocation5 + $0x50] sm:$0xff]  ;;  %v77_v18 = vld [vmem:[#allocation5 + $0x68] sm:$0xff]  ;;  %v79_v19 = vld [vmem:[#allocation5 + $0x78] sm:$0xff] }
  0x3b   :  { %444 = vmatprep.subr.bf16.mxu0 %v443_v9  ;;  %v449_v20 = vpack.c.bf16 %v74_v17, %v72_v16  ;;  %v451_v21 = vpack.c.bf16 %v79_v19, %v77_v18  ;;  %v76_v22 = vld [vmem:[#allocation5 + $0x60] sm:$0xff]  ;;  %v78_v23 = vld [vmem:[#allocation5 + $0x70] sm:$0xff]  ;;  %v81_v24 = vld [vmem:[#allocation5 + $0x88] sm:$0xff] }
  0x3c   :  { %v83_v25 = vld [vmem:[#allocation5 + $0x98] sm:$0xff]  ;;  %v80_v26 = vld [vmem:[#allocation5 + $0x80] sm:$0xff]  ;;  %v82_v27 = vld [vmem:[#allocation5 + $0x90] sm:$0xff]  ;;  %v453_v31 = vpack.c.bf16 %v78_v23, %v76_v22 }
  0x3d   :  { %v180_v28 = vld [vmem:[#allocation7 + $0x8] sm:$0xff]  ;;  %v182_v29 = vld [vmem:[#allocation7 + $0x18] sm:$0xff]  ;;  %v179_v30 = vld [vmem:[#allocation7] sm:$0xff]  ;;  %v455_v36 = vpack.c.bf16 %v83_v25, %v81_v24  ;;  %v457_v46 = vpack.c.bf16 %v82_v27, %v80_v26 }
  0x3e   :  { %446 = vmatpush1.bf16.msra.mxu0 %v445_v14  ;;  %v788_v32 = vpack.c.bf16 %v182_v29, %v180_v28  ;;  %v181_v33 = vld [vmem:[#allocation7 + $0x10] sm:$0xff]  ;;  %v184_v34 = vld [vmem:[#allocation7 + $0x28] sm:$0xff]  ;;  %v186_v35 = vld [vmem:[#allocation7 + $0x38] sm:$0xff] }
  0x3f   :  { %448 = vmatprep.subr.bf16.mxu0 %v447_v15  ;;  %v790_v37 = vpack.c.bf16 %v181_v33, %v179_v30  ;;  %v792_v38 = vpack.c.bf16 %v186_v35, %v184_v34  ;;  %v183_v39 = vld [vmem:[#allocation7 + $0x20] sm:$0xff]  ;;  %v185_v40 = vld [vmem:[#allocation7 + $0x30] sm:$0xff]  ;;  %v188_v41 = vld [vmem:[#allocation7 + $0x48] sm:$0xff] }
  0x40   :  { %v85_v42 = vld [vmem:[#allocation5 + $0xa8] sm:$0xff]  ;;  %v87_v43 = vld [vmem:[#allocation5 + $0xb8] sm:$0xff]  ;;  %472 = vmatprep.subr.bf16.mxu1 %v788_v32  ;;  %v796_v45 = vpack.c.bf16 %v185_v40, %v183_v39  ;;  %v84_v47 = vld [vmem:[#allocation5 + $0xa0] sm:$0xff] }
  0x41   :  { %v190_v44 = vld [vmem:[#allocation7 + $0x58] sm:$0xff]  ;;  %474 = vmatpush1.bf16.msra.mxu1 %v790_v37  ;;  %v187_v49 = vld [vmem:[#allocation7 + $0x40] sm:$0xff]  ;;  %v189_v50 = vld [vmem:[#allocation7 + $0x50] sm:$0xff]  ;;  %v459_v51 = vpack.c.bf16 %v87_v43, %v85_v42 }
  0x42   :  { %450 = vmatpush1.bf16.msra.mxu0 %v449_v20  ;;  %476 = vmatprep.subr.bf16.mxu1 %v792_v38  ;;  %v799_v48 = vpack.c.bf16 %v190_v44, %v188_v41  ;;  %v86_v52 = vld [vmem:[#allocation5 + $0xb0] sm:$0xff]  ;;  %v192_v53 = vld [vmem:[#allocation7 + $0x68] sm:$0xff]  ;;  %v194_v54 = vld [vmem:[#allocation7 + $0x78] sm:$0xff]  ;;  %v802_v57 = vpack.c.bf16 %v189_v50, %v187_v49 }
  0x43   :  { %452 = vmatprep.subr.bf16.mxu0 %v451_v21  ;;  %v89_v55 = vld [vmem:[#allocation5 + $0xc8] sm:$0xff]  ;;  %v91_v56 = vld [vmem:[#allocation5 + $0xd8] sm:$0xff]  ;;  %v461_v58 = vpack.c.bf16 %v86_v52, %v84_v47  ;;  %v88_v59 = vld [vmem:[#allocation5 + $0xc0] sm:$0xff]  ;;  %v805_v60 = vpack.c.bf16 %v194_v54, %v192_v53 }
  0x44   :  { %v191_v61 = vld [vmem:[#allocation7 + $0x60] sm:$0xff]  ;;  %v193_v62 = vld [vmem:[#allocation7 + $0x70] sm:$0xff]  ;;  %v463_v63 = vpack.c.bf16 %v91_v56, %v89_v55  ;;  %v196_v1 = vld [vmem:[#allocation7 + $0x88] sm:$0xff] }
  0x45   :  { %478 = vmatpush1.bf16.msra.mxu1 %v796_v45  ;;  %v90_v0 = vld [vmem:[#allocation5 + $0xd0] sm:$0xff]  ;;  %v198_v2 = vld [vmem:[#allocation7 + $0x98] sm:$0xff]  ;;  %v93_v3 = vld [vmem:[#allocation5 + $0xe8] sm:$0xff]  ;;  %v808_v5 = vpack.c.bf16 %v193_v62, %v191_v61 }
  0x46   :  { %454 = vmatpush1.bf16.msra.mxu0 %v453_v31  ;;  %480 = vmatprep.subr.bf16.mxu1 %v799_v48  ;;  %v95_v4 = vld [vmem:[#allocation5 + $0xf8] sm:$0xff]  ;;  %v465_v6 = vpack.c.bf16 %v90_v0, %v88_v59  ;;  %v92_v7 = vld [vmem:[#allocation5 + $0xe0] sm:$0xff]  ;;  %v811_v8 = vpack.c.bf16 %v198_v2, %v196_v1  ;;  %v197_v10 = vld [vmem:[#allocation7 + $0x90] sm:$0xff] }
  0x47   :  { %456 = vmatprep.subr.bf16.mxu0 %v455_v36  ;;  %v195_v9 = vld [vmem:[#allocation7 + $0x80] sm:$0xff]  ;;  %v467_v11 = vpack.c.bf16 %v95_v4, %v93_v3  ;;  %v94_v12 = vld [vmem:[#allocation5 + $0xf0] sm:$0xff]  ;;  %v200_v13 = vld [vmem:[#allocation7 + $0xa8] sm:$0xff] }
  0x48   :  { %v202_v14 = vld [vmem:[#allocation7 + $0xb8] sm:$0xff]  ;;  %v814_v15 = vpack.c.bf16 %v197_v10, %v195_v9  ;;  %v469_v16 = vpack.c.bf16 %v94_v12, %v92_v7  ;;  %v199_v18 = vld [vmem:[#allocation7 + $0xa0] sm:$0xff]  ;;  %v201_v19 = vld [vmem:[#allocation7 + $0xb0] sm:$0xff] }
  0x49   :  { %482 = vmatpush1.bf16.msra.mxu1 %v802_v57  ;;  %v817_v17 = vpack.c.bf16 %v202_v14, %v200_v13  ;;  %v204_v20 = vld [vmem:[#allocation7 + $0xc8] sm:$0xff]  ;;  %v206_v21 = vld [vmem:[#allocation7 + $0xd8] sm:$0xff]  ;;  %v820_v22 = vpack.c.bf16 %v201_v19, %v199_v18  ;;  %v203_v25 = vld [vmem:[#allocation7 + $0xc0] sm:$0xff]  ;;  %v98_v18 = vlaneseq }
  0x4a   :  { %458 = vmatpush1.bf16.msra.mxu0 %v457_v46  ;;  %484 = vmatprep.subr.bf16.mxu1 %v805_v60  ;;  %v63_v23 = vld [vmem:[#allocation2] sm:$0xff]  ;;  %v823_v24 = vpack.c.bf16 %v206_v21, %v204_v20  ;;  %v205_v26 = vld [vmem:[#allocation7 + $0xd0] sm:$0xff]  ;;  %v208_v27 = vld [vmem:[#allocation7 + $0xe8] sm:$0xff] }
  0x4b   :  { %460 = vmatprep.subr.bf16.mxu0 %v459_v51  ;;  %v210_v28 = vld [vmem:[#allocation7 + $0xf8] sm:$0xff]  ;;  %v827_v29 = vpack.c.bf16 %v205_v26, %v203_v25  ;;  %v207_v31 = vld [vmem:[#allocation7 + $0xe0] sm:$0xff]  ;;  %v209_v33 = vld [vmem:[#allocation7 + $0xf0] sm:$0xff]  ;;  %v99_v19 = vshrl.u32 %v98_v18, 7 }
  0x4c   :  { %v830_v30 = vpack.c.bf16 %v210_v28, %v208_v27  ;;  %v212_v34 = vld [vmem:[#allocation7 + $0x108] sm:$0xff]  ;;  %v214_v35 = vld [vmem:[#allocation7 + $0x118] sm:$0xff]  ;;  %v211_v39 = vld [vmem:[#allocation7 + $0x100] sm:$0xff] }
  0x4d   :  { %486 = vmatpush1.bf16.msra.mxu1 %v808_v5  ;;  %v838_v36 = vpack.c.bf16 %v214_v35, %v212_v34  ;;  %v213_v40 = vld [vmem:[#allocation7 + $0x110] sm:$0xff]  ;;  %v216_v41 = vld [vmem:[#allocation7 + $0x128] sm:$0xff]  ;;  %v218_v42 = vld [vmem:[#allocation7 + $0x138] sm:$0xff]  ;;  %v104_v20 = vsub.s32 1, %v99_v19 }
  0x4e   :  { %462 = vmatpush1.bf16.msra.mxu0 %v461_v58  ;;  %488 = vmatprep.subr.bf16.mxu1 %v811_v8  ;;  %v215_v43 = vld [vmem:[#allocation7 + $0x120] sm:$0xff]  ;;  %v217_v44 = vld [vmem:[#allocation7 + $0x130] sm:$0xff]  ;;  %v220_v46 = vld [vmem:[#allocation7 + $0x148] sm:$0xff] }
  0x4f   :  { %464 = vmatprep.subr.bf16.mxu0 %v463_v63  ;;  %v222_v47 = vld [vmem:[#allocation7 + $0x158] sm:$0xff]  ;;  %v219_v50 = vld [vmem:[#allocation7 + $0x140] sm:$0xff]  ;;  %v224_v51 = vld [vmem:[#allocation7 + $0x168] sm:$0xff] }
  0x50   :  { %v511_v49 = vpack.c.bf16 %v222_v47, %v220_v46  ;;  %v226_v52 = vld [vmem:[#allocation7 + $0x178] sm:$0xff]  ;;  %v223_v55 = vld [vmem:[#allocation7 + $0x160] sm:$0xff]  ;;  %v225_v56 = vld [vmem:[#allocation7 + $0x170] sm:$0xff] }
  0x51   :  { %490 = vmatpush1.bf16.msra.mxu1 %v814_v15  ;;  %v515_v54 = vpack.c.bf16 %v226_v52, %v224_v51  ;;  %v230_v58 = vld [vmem:[#allocation7 + $0x198] sm:$0xff]  ;;  %v517_v59 = vpack.c.bf16 %v225_v56, %v223_v55  ;;  %v227_v61 = vld [vmem:[#allocation7 + $0x180] sm:$0xff]  ;;  %v229_v62 = vld [vmem:[#allocation7 + $0x190] sm:$0xff] }
  0x52   :  { %466 = vmatpush1.bf16.msra.mxu0 %v465_v6  ;;  %492 = vmatprep.subr.bf16.mxu1 %v817_v17  ;;  %v232_v63 = vld [vmem:[#allocation7 + $0x1a8] sm:$0xff]  ;;  %v234_v0 = vld [vmem:[#allocation7 + $0x1b8] sm:$0xff]  ;;  %v521_v1 = vpack.c.bf16 %v229_v62, %v227_v61  ;;  %v231_v3 = vld [vmem:[#allocation7 + $0x1a0] sm:$0xff] }
  0x53   :  { %468 = vmatprep.subr.bf16.mxu0 %v467_v11  ;;  %v523_v2 = vpack.c.bf16 %v234_v0, %v232_v63  ;;  %v233_v4 = vld [vmem:[#allocation7 + $0x1b0] sm:$0xff]  ;;  %v238_v6 = vld [vmem:[#allocation7 + $0x1d8] sm:$0xff]  ;;  %v235_v9 = vld [vmem:[#allocation7 + $0x1c0] sm:$0xff] }
  0x54   :  { %v525_v7 = vpack.c.bf16 %v233_v4, %v231_v3  ;;  %v237_v10 = vld [vmem:[#allocation7 + $0x1d0] sm:$0xff]  ;;  %v240_v12 = vld [vmem:[#allocation7 + $0x1e8] sm:$0xff]  ;;  %v242_v13 = vld [vmem:[#allocation7 + $0x1f8] sm:$0xff] }
  0x55   :  { %494 = vmatpush1.bf16.msra.mxu1 %v820_v22  ;;  %v529_v11 = vpack.c.bf16 %v237_v10, %v235_v9  ;;  %v531_v14 = vpack.c.bf16 %v242_v13, %v240_v12  ;;  %v96_v21 = vld [vmem:[%s879_s2] sm:$0x3] }
  0x56   :  { %470 = vmatpush1.bf16.msra.mxu0 %v469_v16  ;;  %496 = vmatprep.subr.bf16.mxu1 %v823_v24  ;;  %v241_v16 = vld [vmem:[#allocation7 + $0x1f0] sm:$0xff] }
  0x57   :  { %536 = vmatprep.subr.bf16.mxu0 %v788_v32  ;;  %v835_v32 = vpack.c.bf16 %v209_v33, %v207_v31 }
  0x59   :  { %173 = vmatmul.mubr.f32.vlgmr.msra.gmra.mrb[0].mxu0 %v63_v23  ;;  %498 = vmatpush1.bf16.msra.mxu1 %v827_v29  ;;  %v105_v23 = vrot.slane %v96_v21, %v104_v20 }
  0x5a   :  { %538 = vmatpush1.bf16.msra.mxu0 %v790_v37  ;;  %500 = vmatprep.subr.bf16.mxu1 %v830_v30  ;;  %v505_v37 = vpack.c.bf16 %v213_v40, %v211_v39 }
  0x5b   :  { %540 = vmatprep.subr.bf16.mxu0 %v792_v38  ;;  %v507_v38 = vpack.c.bf16 %v218_v42, %v216_v41  ;;  %v393_v41 = vld [vmem:[%s880_s3] sm:$0x3]  ;;  %s676_s3 = scalar_lea.vmem %s430_s14, 256 }
  0x5c   :  { %v407_v42 = vld [vmem:[%s881_s4] sm:$0x3]  ;;  %p677_p10 = scmp.ne.s32.totalorder %s430_s14, %s676_s3  ;;  %p682_p12 = scmp.lt.s32.totalorder %s676_s3, %s676_s3 }
  0x5d   :  { %502 = vmatpush1.bf16.msra.mxu1 %v835_v32 }
  0x5e   :  { %542 = vmatpush1.bf16.msra.mxu0 %v796_v45  ;;  %504 = vmatprep.subr.bf16.mxu1 %v838_v36  ;;  %v509_v45 = vpack.c.bf16 %v217_v44, %v215_v43  ;;  %v402_v43 = vrot.slane %v393_v41, %v104_v20  ;;  %p683_p13 = por %p682_p12, %p681_p11 }
  0x5f   :  { %544 = vmatprep.subr.bf16.mxu0 %v799_v48  ;;  %v221_v48 = vld [vmem:[#allocation7 + $0x150] sm:$0xff] }
  0x60   :  { %v513_v53 = vpack.c.bf16 %v221_v48, %v219_v50  ;;  %p684_p0 = pnand %p683_p13, %p677_p10 }
  0x61   :  { %506 = vmatpush1.bf16.msra.mxu1 %v505_v37 }
  0x62   :  { %546 = vmatpush1.bf16.msra.mxu0 %v802_v57  ;;  %508 = vmatprep.subr.bf16.mxu1 %v507_v38  ;;  %v228_v57 = vld [vmem:[#allocation7 + $0x188] sm:$0xff] }
  0x63   :  { %548 = vmatprep.subr.bf16.mxu0 %v805_v60  ;;  %v519_v60 = vpack.c.bf16 %v230_v58, %v228_v57 }
  0x65   :  { %510 = vmatpush1.bf16.msra.mxu1 %v509_v45 }
  0x66   :  { %550 = vmatpush1.bf16.msra.mxu0 %v808_v5  ;;  %512 = vmatprep.subr.bf16.mxu1 %v511_v49  ;;  %v236_v5 = vld [vmem:[#allocation7 + $0x1c8] sm:$0xff] }
  0x67   :  { %552 = vmatprep.subr.bf16.mxu0 %v811_v8  ;;  %v527_v8 = vpack.c.bf16 %v238_v6, %v236_v5 }
  0x69   :  { %514 = vmatpush1.bf16.msra.mxu1 %v513_v53 }
  0x6a   :  { %554 = vmatpush1.bf16.msra.mxu0 %v814_v15  ;;  %516 = vmatprep.subr.bf16.mxu1 %v515_v54  ;;  %v239_v15 = vld [vmem:[#allocation7 + $0x1e0] sm:$0xff] }
  0x6b   :  { %556 = vmatprep.subr.bf16.mxu0 %v817_v17  ;;  %v533_v17 = vpack.c.bf16 %v241_v16, %v239_v15 }
  0x6d   :  { %518 = vmatpush1.bf16.msra.mxu1 %v517_v59 }
  0x6e   :  { %558 = vmatpush1.bf16.msra.mxu0 %v820_v22  ;;  %520 = vmatprep.subr.bf16.mxu1 %v519_v60  ;;  %v100_v22 = vsub.s32 0, %v99_v19 }
  0x6f   :  { %560 = vmatprep.subr.bf16.mxu0 %v823_v24 }
  0x70   :  { %v101_v24 = vrot.slane %v96_v21, %v100_v22  ;;  %v412_v47 = vrot.slane %v407_v42, %v100_v22 }
  0x71   :  { %522 = vmatpush1.bf16.msra.mxu1 %v521_v1 }
  0x72   :  { %562 = vmatpush1.bf16.msra.mxu0 %v827_v29  ;;  %524 = vmatprep.subr.bf16.mxu1 %v523_v2 }
  0x73   :  { %564 = vmatprep.subr.bf16.mxu0 %v830_v30 }
  0x75   :  { %526 = vmatpush1.bf16.msra.mxu1 %v525_v7 }
  0x76   :  { %566 = vmatpush1.bf16.msra.mxu0 %v835_v32  ;;  %528 = vmatprep.subr.bf16.mxu1 %v527_v8 }
  0x77   :  { %568 = vmatprep.subr.bf16.mxu0 %v838_v36 }
  0x79   :  { %530 = vmatpush1.bf16.msra.mxu1 %v529_v11 }
  0x7a   :  { %570 = vmatpush1.bf16.msra.mxu0 %v505_v37  ;;  %532 = vmatprep.subr.bf16.mxu1 %v531_v14  ;;  %v398_v37 = vrot.slane %v393_v41, %v100_v22 }
  0x7b   :  { %572 = vmatprep.subr.bf16.mxu0 %v507_v38 }
  0x7d   :  { %534 = vmatpush1.bf16.msra.mxu1 %v533_v17 }
  0x7e   :  { %574 = vmatpush1.bf16.msra.mxu0 %v509_v45 }
  0x7f   :  { %576 = vmatprep.subr.bf16.mxu0 %v511_v49  ;;  %v416_v49 = vrot.slane %v407_v42, %v104_v20 }
  0x82   :  { %578 = vmatpush1.bf16.msra.mxu0 %v513_v53 }
  0x83   :  { %580 = vmatprep.subr.bf16.mxu0 %v515_v54 }
  0x86   :  { %582 = vmatpush1.bf16.msra.mxu0 %v517_v59 }
  0x87   :  { %584 = vmatprep.subr.bf16.mxu0 %v519_v60 }
  0x8a   :  { %586 = vmatpush1.bf16.msra.mxu0 %v521_v1 }
  0x8b   :  { %588 = vmatprep.subr.bf16.mxu0 %v523_v2 }
  0x8e   :  { %590 = vmatpush1.bf16.msra.mxu0 %v525_v7 }
  0x8f   :  { %592 = vmatprep.subr.bf16.mxu0 %v527_v8 }
  0x92   :  { %594 = vmatpush1.bf16.msra.mxu0 %v529_v11 }
  0x93   :  { %596 = vmatprep.subr.bf16.mxu0 %v531_v14 }
  0x96   :  { %598 = vmatpush1.bf16.msra.mxu0 %v533_v17 }
 0x12c   :  { %v174_v25 = vpop.f32.mrb[0].mxu0 }
 0x12d   :  { %v176_v26 = vpop.f32.mrb[1].mxu0  ;;  %v175_v28 = vadd.f32 %v174_v25, %v101_v24 }
 0x12e   :  { %v177_v27 = vadd.f32 %v176_v26, %v105_v23 }
 0x130   :  { %307 = vmatprep.mubr.f32.mxu1 %v177_v27 }
 0x131   :  { %308 = vmatmul.mubr.f32.vlgmr.msra.gmra.mrb[0].mxu1 %v175_v28 }
 0x204   :  { %v309_v29 = vpop.f32.mrb[0].mxu1 }
 0x205   :  { %v314_v30 = vsub.f32 %v175_v28, %v309_v29  ;;  %v311_v31 = vpop.f32.mrb[1].mxu1 }
 0x206   :  { %v315_v33 = vsub.f32 %v177_v27, %v311_v31 }
 0x207   :  { %v316_v35 = vmul.f32 %v314_v30, %v314_v30 }
 0x208   :  { %v317_v34 = vmul.f32 %v315_v33, %v315_v33 }
 0x20a   :  { %382 = vmatprep.mubr.f32.mxu0 %v317_v34 }
 0x20b   :  { %383 = vmatmul.mubr.f32.vlgmr.msra.gmra.mrb[2].mxu0 %v316_v35 }
 0x2de   :  { %v384_v32 = vpop.f32.mrb[2].mxu0 }
 0x2df   :  { %v385_v36 = vadd.f32 1e-05, %v384_v32  ;;  %v386_v39 = vpop.f32.mrb[3].mxu0 }
 0x2e0   :  { %v387_v40 = vadd.f32 1e-05, %v386_v39 }
 0x2e1   :  { %606 = vrsqrt.f32 %v385_v36 }
 0x2e2   :  { %608 = vrsqrt.f32 %v387_v40 }
 0x2eb   :  { %v607_v38 = vpop.eup %606 }
 0x2ec   :  { %v609_v44 = vpop.eup %608  ;;  %v391_v46 = vmul.f32 %v607_v38, %v314_v30 }
 0x2ed   :  { %v392_v45 = vmul.f32 %v609_v44, %v315_v33 }
 0x2ee   :  { %v405_v50 = vmul.f32 %v398_v37, %v391_v46 }
 0x2ef   :  { %v406_v48 = vmul.f32 %v402_v43, %v392_v45 }
 0x2f0   :  { %v419_v51 = vadd.f32 %v412_v47, %v405_v50 }
 0x2f1   :  { %v420_v52 = vadd.f32 %v416_v49, %v406_v48 }
 0x2f2   :  { %421 = vst [vmem:[#allocation8] sm:$0xff] %v419_v51 }
 0x2f3   :  { %422 = vst [vmem:[#allocation8 + $0x8] sm:$0xff] %v420_v52 }
 0x2f4   :  { %687 = shalt.err (!%p684_p0)
}
 0x2f5   :  { %s688_s16 = scalar_lea.hbm %s883_s6, 256 }
 0x2f6   :  { %p689_p1 = scmp.ne.s32.totalorder %s883_s6, %s688_s16  ;;  %p692_p2 = scmp.lt.u32.totalorder %s688_s16, %s883_s6 }
 0x2f8   :  { %p694_p3 = pnand %p692_p2, %p689_p1 }
 0x2fa   :  { %697 = shalt.err (!%p694_p3)
}
 0x2fb   :  { %432 = dma.vmem_to_hbm [thread:$0]  %s430_s14, 256, %s883_s6, [#allocation4]  }
 0x2fc   :  { %702 = dma.done.wait [#allocation4], 256  }
 0x2fd   :  { %703 = vsyncadd [#allocation4], 4294967040 }
 0x2fe   :  { %436 = vsyncpa [#allocation3], 1 }
 0x2ff   :  { %437 = vsyncpa [#allocation6], 1 }
 0x300   :  { %438 = vsyncpa [#allocation4], 1 }

</bundles_post_ra>
